<compile_context>
chip_gen: v7x
topology: tpu7x:2x2x1
jax: 0.10.0
libtpu: 0.0.40
codegen_flags: <defaults>
</compile_context>

<pallas_src>
import math
import numpy as np
import jax
import jax.numpy as jnp
from jax.experimental import pallas as pl
from jax.experimental.pallas import tpu as pltpu


# ---------------------------------------------------------------------------
# Fused kernel: all modalities + folded W_out epilogue in one grid step.
# Ref layout: [scal(SMEM), t1, (t2_i, xvT_i)*M, (Wm_i, bvo_i)*M, bout, out]
# ---------------------------------------------------------------------------
def _make_fused_kernel(n_mod):
    def kernel(*refs):
        scal_ref = refs[0]                       # (1 + 2*M,) f32 in SMEM
        t1_ref = refs[1]                         # (bb, T1, 1) query times
        data = refs[2:2 + 2 * n_mod]             # (t2_i, xvT_i) pairs
        wts = refs[2 + 2 * n_mod:2 + 4 * n_mod]  # (Wm_i, bvo_i) pairs
        bout_ref = refs[2 + 4 * n_mod]           # (1, d_out)
        o_ref = refs[3 + 4 * n_mod]              # (bb*T1, d_out)

        rows = o_ref.shape[0]                    # bb * T1
        t1 = t1_ref[...]                         # (bb, T1, 1)
        wq = scal_ref[0]

        # Accumulate in the resident output VMEM block (bounds vreg pressure);
        # initialize once with the output bias.
        o_ref[...] = jnp.broadcast_to(bout_ref[...], o_ref.shape)

        for i in range(n_mod):
            t2_ref, xvt_ref = data[2 * i], data[2 * i + 1]
            wm_ref, bvo_ref = wts[2 * i], wts[2 * i + 1]

            t2 = t2_ref[...]                     # (bb, 1, T2) key times
            wk = scal_ref[1 + 2 * i]
            neg_inv_tau = scal_ref[2 + 2 * i]    # -1/tau (sign pre-folded)

            # gaussian score: with Q=[wq*t1, 1], K=[1, -wk*t2]:
            #   Q.K^T == wq*t1 - wk*t2   (pure VPU broadcast, no MXU matmul)
            diff = wq * t1 - wk * t2             # (bb, T1, T2)
            # s <= 0 always -> exp(s) <= 1: no max-subtraction needed.
            # (Caveat: tiny tau / huge time deltas could underflow a whole
            #  row to 0; not the case for this module's time/tau ranges.)
            s = (diff * diff) * neg_inv_tau
            mask = t1 < t2                       # causal mask on raw times
            e = jnp.where(mask, 0.0, jnp.exp(s))            # unnormalized
            denom = jnp.sum(e, axis=-1, keepdims=True)      # (bb, T1, 1)
            dead = denom == 0.0                  # rows with every key masked
            inv_denom = jnp.where(dead, 0.0, 1.0 / denom)
            alive = jnp.where(dead, 0.0, 1.0)

            # unnormalized PV product; xvT is (bb, d_in, T2): contract the
            # last dims of both (same pattern as q@k^T in flash attention).
            y_un = jnp.einsum('btl,bdl->btd', e, xvt_ref[...],
                              preferred_element_type=jnp.float32)
            # deferred softmax normalization on the small (bb,T1,d_in) tensor
            y = (y_un * inv_denom).reshape(rows, -1)        # (bb*T1, d_in)
            alive2d = alive.reshape(rows, 1)

            # folded epilogue: (A@Xv)@(Wv^T Wout_m) + alive * (bv Wout_m)
            o_ref[...] += (jnp.dot(y, wm_ref[...],
                                   preferred_element_type=jnp.float32)
                           + alive2d * bvo_ref[...])

    return kernel


# ---------------------------------------------------------------------------
# Block sizing helpers
# ---------------------------------------------------------------------------
def _round_up(x, m):
    return -(-x // m) * m


def _per_row_vmem_bytes(t1_len, t2_lens, d_ins, d_out):
    """Rough padded f32 VMEM bytes per batch row for one grid step."""
    b = _round_up(t1_len, 8) * 128 * 4                          # t1 column
    b += _round_up(t1_len, 8) * _round_up(d_out, 128) * 4       # output rows
    for t2, d_in in zip(t2_lens, d_ins):
        b += 8 * _round_up(t2, 128) * 4                         # t2 row
        b += _round_up(d_in, 8) * _round_up(t2, 128) * 4        # xv^T
        b += 2 * _round_up(t1_len, 8) * _round_up(t2, 128) * 4  # score/e temps
        b += _round_up(t1_len, 8) * _round_up(d_in, 128) * 4    # y
    return b


def _pick_batch_block(n, t1_len, per_row_bytes, *, target=256,
                      vmem_budget_bytes=40 << 20):
    """Large batch block sized from the VMEM footprint; N is padded later."""
    bb = min(target, max(n, 1))
    # v7x has 2 TensorCores: keep >= 2 grid steps when the batch allows it so
    # the "parallel" axis can be sharded across them (harmless on v5e/v6e).
    if n > 1 and bb >= n:
        bb = -(-n // 2)
    # the 2-D output block (bb*T1, d_out) needs its sublane dim % 8 == 0
    align = 8 // math.gcd(t1_len, 8)
    bb = _round_up(bb, align)
    # shrink until the double-buffered per-step footprint fits the budget
    while bb > align and 2 * bb * per_row_bytes > vmem_budget_bytes:
        bb = _round_up(max(align, bb // 2), align)
    return bb


# ---------------------------------------------------------------------------
# Forward pass: one fused pallas_call (wrapper does layout plumbing only)
# ---------------------------------------------------------------------------
def multimodal_attention_forward(batch, params, *, batch_block_target=256):
    modalities = tuple(params["modalities"])
    M = len(modalities)
    ref = jnp.asarray(batch["reference"], jnp.float32)        # (N, 1, T1, 1)
    N, _, T1, _ = ref.shape
    d_v = params["W_V"][modalities[0]]["w"].shape[0]
    d_out = params["W_out"]["w"].shape[0]

    # --- per-modality data (lane-dense layouts) + offline-folded weights ---
    t1 = ref[:, 0, :, -1:]                                    # (N, T1, 1)
    wout_T = jnp.asarray(params["W_out"]["w"], jnp.float32).T  # (M*d_v, d_out)
    bout = jnp.asarray(params["W_out"]["b"], jnp.float32).reshape(1, d_out)

    t2s, xvts, wms, bvos, t2_lens, d_ins = [], [], [], [], [], []
    for i, m in enumerate(modalities):
        X = jnp.asarray(batch[m], jnp.float32)                # (N, 1, T2, d)
        T2 = X.shape[2]
        t2s.append(X[:, 0, :, -1][:, None, :])                # (N, 1, T2)
        xvts.append(jnp.swapaxes(X[:, 0, :, :-2], 1, 2))      # (N, d_in, T2)
        t2_lens.append(T2)
        d_ins.append(xvts[-1].shape[1])
        wo_slice = wout_T[i * d_v:(i + 1) * d_v, :]                  # (d_v, d_out)
        wv_T = jnp.asarray(params["W_V"][m]["w"], jnp.float32).T     # (d_in, d_v)
        wms.append(wv_T @ wo_slice)                                  # (d_in, d_out)
        bv = jnp.asarray(params["W_V"][m]["b"], jnp.float32)         # (d_v,)
        bvos.append((bv @ wo_slice).reshape(1, d_out))               # (1, d_out)

    # --- batch block, padding, VMEM budget ---
    per_row = _per_row_vmem_bytes(T1, t2_lens, d_ins, d_out)
    bb = _pick_batch_block(N, T1, per_row, target=batch_block_target)
    n_pad = _round_up(N, bb)
    if n_pad != N:
        padw = ((0, n_pad - N), (0, 0), (0, 0))
        t1 = jnp.pad(t1, padw)
        t2s = [jnp.pad(t, padw) for t in t2s]
        xvts = [jnp.pad(x, padw) for x in xvts]
    grid = (n_pad // bb,)
    vmem_limit = int(min(48 << 20, max(32 << 20, 4 * bb * per_row + (2 << 20))))

    # --- scalar params -> one small f32 SMEM array: [wq, (wk_i, -1/tau_i)*M]
    scal_parts = [jnp.asarray(params["W_Q"], jnp.float32).reshape(-1)[:1]]
    for m in modalities:
        wk = jnp.asarray(params["W_K"][m], jnp.float32).reshape(-1)[:1]
        neg_inv_tau = (-jnp.exp(
            -jnp.asarray(params["log_tau"][m], jnp.float32))).reshape(1)
        scal_parts.extend([wk, neg_inv_tau])
    scal = jnp.concatenate(scal_parts)

    # --- assemble the fused pallas_call ---
    inputs = [scal, t1]
    in_specs = [pl.BlockSpec(memory_space=pltpu.MemorySpace.SMEM),
                pl.BlockSpec((bb, T1, 1), lambda n: (n, 0, 0))]
    for t2, xvt in zip(t2s, xvts):
        T2, d_in = t2.shape[-1], xvt.shape[1]
        inputs.extend([t2, xvt])
        in_specs.extend([
            pl.BlockSpec((bb, 1, T2), lambda n: (n, 0, 0)),
            pl.BlockSpec((bb, d_in, T2), lambda n: (n, 0, 0)),
        ])
    for wm, bvo in zip(wms, bvos):
        inputs.extend([wm, bvo])
        in_specs.extend([
            pl.BlockSpec(wm.shape, lambda n: (0, 0)),
            pl.BlockSpec((1, d_out), lambda n: (0, 0)),
        ])
    inputs.append(bout)
    in_specs.append(pl.BlockSpec((1, d_out), lambda n: (0, 0)))

    out2d = pl.pallas_call(
        _make_fused_kernel(M),
        out_shape=jax.ShapeDtypeStruct((n_pad * T1, d_out), jnp.float32),
        grid=grid,
        in_specs=in_specs,
        out_specs=pl.BlockSpec((bb * T1, d_out), lambda n: (n, 0)),
        compiler_params=pltpu.CompilerParams(
            dimension_semantics=("parallel",),
            vmem_limit_bytes=vmem_limit),
    )(*inputs)

    return out2d.reshape(n_pad, T1, d_out)[:N]


# ---------------------------------------------------------------------------
# Pure-JAX reference (for verification)
# ---------------------------------------------------------------------------
def reference_forward(batch, params):
    hi = jax.lax.Precision.HIGHEST
    ref = batch["reference"]
    N, _, T1, _ = ref.shape
    t1 = ref[:, 0, :, -1]
    q_proj = ref[:, 0] @ params["W_Q"].T
    Q = jnp.concatenate([q_proj, jnp.ones_like(q_proj[..., :1])], axis=-1)
    outs = []
    for m in params["modalities"]:
        X = batch[m]
        t2 = X[:, 0, :, -1]
        k_proj = X[:, 0, :, -1:] @ params["W_K"][m].T
        K = jnp.concatenate([jnp.ones_like(k_proj[..., :1]), -k_proj], axis=-1)
        Xv = X[:, 0, :, :-2]
        V = jnp.matmul(Xv, params["W_V"][m]["w"].T, precision=hi) + params["W_V"][m]["b"]
        tau = jnp.exp(params["log_tau"][m])
        S = jnp.einsum("ntc,nlc->ntl", Q, K, precision=hi)
        S = -(S ** 2) / tau
        mask = t1[:, :, None] < t2[:, None, :]
        S = jnp.where(mask, -jnp.inf, S)
        A = jax.nn.softmax(S, axis=-1)
        dead = jnp.all(mask, axis=-1, keepdims=True)
        A = jnp.where(dead, 0.0, A)
        outs.append(jnp.einsum("ntl,nlc->ntc", A, V, precision=hi))
    Z = jnp.stack(outs, axis=2).reshape(N, T1, -1)
    return jnp.matmul(Z, params["W_out"]["w"].T, precision=hi) + params["W_out"]["b"]


# ---------------------------------------------------------------------------
if __name__ == "__main__":
    key = jax.random.PRNGKey(0)
    N, T1 = 2, 8
    mods = {"m1": (8, 6), "m2": (16, 8)}   # name -> (T2, raw feature dim incl. time)
    d_v = d_out = 8
    M = len(mods)

    keys = jax.random.split(key, 16)

    # inputs: batch = {"reference": (N,1,T1,1), "m1": (N,1,T2,d), ...}
    t_ref = jnp.sort(jax.random.uniform(keys[0], (N, T1)), axis=-1)
    batch = {"reference": t_ref[:, None, :, None].astype(jnp.float32)}
    for i, (m, (T2, d)) in enumerate(mods.items()):
        kt, kf = jax.random.split(keys[1 + i])
        t2 = jnp.sort(jax.random.uniform(kt, (N, T2)), axis=-1)
        feats = jax.random.normal(kf, (N, T2, d - 1))
        batch[m] = jnp.concatenate([feats, t2[..., None]], axis=-1)[:, None].astype(jnp.float32)

    # deterministic parameters (module __init__ with n_layers=0, d_qk=1,
    # qk_type='time', weight_type='gaussian', init_random=False, init_tau=1).
    # W_Q / W_K first layers are frozen to [[1.0]]; W_V / W_out are random
    # (the block-identity init in the module always falls into its except).
    params = {
        "modalities": tuple(mods.keys()),
        "W_Q": jnp.array([[1.0]], jnp.float32),
        "W_K": {m: jnp.array([[1.0]], jnp.float32) for m in mods},
        "W_V": {},
        "log_tau": {m: jnp.float32(math.log(1.0)) for m in mods},
    }
    for i, (m, (T2, d)) in enumerate(mods.items()):
        kw, kb = jax.random.split(keys[8 + i])
        d_in_v = d - 2
        params["W_V"][m] = {
            "w": (0.3 * jax.random.normal(kw, (d_v, d_in_v))).astype(jnp.float32),
            "b": (0.1 * jax.random.normal(kb, (d_v,))).astype(jnp.float32),
        }
    kw, kb = jax.random.split(keys[12])
    params["W_out"] = {
        "w": (0.3 * jax.random.normal(kw, (d_out, M * d_v))).astype(jnp.float32),
        "b": (0.1 * jax.random.normal(kb, (d_out,))).astype(jnp.float32),
    }

    yhat = multimodal_attention_forward(batch, params)
    yhat = jax.block_until_ready(yhat)
    assert yhat.shape == (N, T1, d_out)

    yref = reference_forward(batch, params)
    np.testing.assert_allclose(np.asarray(yhat), np.asarray(yref),
                               rtol=1e-4, atol=1e-4)
    print("KERNEL_OK")
</pallas_src>

<mosaic_0001>
module attributes {stable_mosaic.version = 11 : i64} {
  func.func @kernel(%arg0: i32, %arg1: memref<5xf32, #tpu.memory_space<smem>>, %arg2: memref<1x8x1xf32, #tpu.memory_space<vmem>>, %arg3: memref<1x1x8xf32, #tpu.memory_space<vmem>>, %arg4: memref<1x4x8xf32, #tpu.memory_space<vmem>>, %arg5: memref<1x1x16xf32, #tpu.memory_space<vmem>>, %arg6: memref<1x6x16xf32, #tpu.memory_space<vmem>>, %arg7: memref<4x8xf32, #tpu.memory_space<vmem>>, %arg8: memref<1x8xf32, #tpu.memory_space<vmem>>, %arg9: memref<6x8xf32, #tpu.memory_space<vmem>>, %arg10: memref<1x8xf32, #tpu.memory_space<vmem>>, %arg11: memref<1x8xf32, #tpu.memory_space<vmem>>, %arg12: memref<8x8xf32, #tpu.memory_space<vmem>>) attributes {dimension_semantics = [#tpu.dimension_semantics<parallel>], iteration_bounds = array<i64: 2>, scalar_prefetch = 0 : i64, scratch_operands = 0 : i64, tpu.core_type = #tpu.core_type<tc>, window_params = [{transform_indices = @transform_0, window_bounds = array<i64: 5>}, {transform_indices = @transform_1, window_bounds = array<i64: 1, 8, 1>}, {transform_indices = @transform_2, window_bounds = array<i64: 1, 1, 8>}, {transform_indices = @transform_3, window_bounds = array<i64: 1, 4, 8>}, {transform_indices = @transform_4, window_bounds = array<i64: 1, 1, 16>}, {transform_indices = @transform_5, window_bounds = array<i64: 1, 6, 16>}, {pipeline_mode = #tpu.pipeline_mode<synchronous>, transform_indices = @transform_6, window_bounds = array<i64: 4, 8>}, {pipeline_mode = #tpu.pipeline_mode<synchronous>, transform_indices = @transform_7, window_bounds = array<i64: 1, 8>}, {pipeline_mode = #tpu.pipeline_mode<synchronous>, transform_indices = @transform_8, window_bounds = array<i64: 6, 8>}, {pipeline_mode = #tpu.pipeline_mode<synchronous>, transform_indices = @transform_9, window_bounds = array<i64: 1, 8>}, {pipeline_mode = #tpu.pipeline_mode<synchronous>, transform_indices = @transform_10, window_bounds = array<i64: 1, 8>}, {transform_indices = @transform_11, window_bounds = array<i64: 8, 8>}]} {
    %c0 = arith.constant 0 : index
    %c0_0 = arith.constant 0 : index
    %c0_1 = arith.constant 0 : index
    %0 = vector.load %arg2[%c0, %c0_0, %c0_1] : memref<1x8x1xf32, #tpu.memory_space<vmem>>, vector<1x8x1xf32>
    %c0_2 = arith.constant 0 : index
    %1 = memref.load %arg1[%c0_2] : memref<5xf32, #tpu.memory_space<smem>>
    %c0_3 = arith.constant 0 : index
    %c0_4 = arith.constant 0 : index
    %2 = vector.load %arg11[%c0_3, %c0_4] : memref<1x8xf32, #tpu.memory_space<vmem>>, vector<1x8xf32>
    %3 = vector.shape_cast %2 : vector<1x8xf32> to vector<1x8xf32>
    %4 = vector.broadcast %3 : vector<1x8xf32> to vector<8x8xf32>
    %c0_5 = arith.constant 0 : index
    %c0_6 = arith.constant 0 : index
    %5 = vector.load %arg12[%c0_5, %c0_6] : memref<8x8xf32, #tpu.memory_space<vmem>>, vector<8x8xf32>
    tpu.vector_store %arg12[%c0_5, %c0_6], %4 {strides = array<i32>} : memref<8x8xf32, #tpu.memory_space<vmem>>, vector<8x8xf32>,
    %c0_7 = arith.constant 0 : index
    %c0_8 = arith.constant 0 : index
    %c0_9 = arith.constant 0 : index
    %6 = vector.load %arg3[%c0_7, %c0_8, %c0_9] : memref<1x1x8xf32, #tpu.memory_space<vmem>>, vector<1x1x8xf32>
    %c1 = arith.constant 1 : index
    %7 = memref.load %arg1[%c1] : memref<5xf32, #tpu.memory_space<smem>>
    %c2 = arith.constant 2 : index
    %8 = memref.load %arg1[%c2] : memref<5xf32, #tpu.memory_space<smem>>
    %9 = vector.broadcast %1 : f32 to vector<1x8x1xf32>
    %10 = arith.mulf %9, %0 : vector<1x8x1xf32>
    %11 = vector.broadcast %7 : f32 to vector<1x1x8xf32>
    %12 = arith.mulf %11, %6 : vector<1x1x8xf32>
    %13 = vector.broadcast %10 : vector<1x8x1xf32> to vector<1x8x8xf32>
    %14 = vector.broadcast %12 : vector<1x1x8xf32> to vector<1x8x8xf32>
    %15 = arith.subf %13, %14 : vector<1x8x8xf32>
    %16 = arith.mulf %15, %15 : vector<1x8x8xf32>
    %17 = vector.broadcast %8 : f32 to vector<1x8x8xf32>
    %18 = arith.mulf %16, %17 : vector<1x8x8xf32>
    %19 = vector.broadcast %0 : vector<1x8x1xf32> to vector<1x8x8xf32>
    %20 = vector.broadcast %6 : vector<1x1x8xf32> to vector<1x8x8xf32>
    %21 = arith.cmpf olt, %19, %20 : vector<1x8x8xf32>
    %22 = math.exp %18 : vector<1x8x8xf32>
    %cst = arith.constant 0.000000e+00 : f32
    %23 = vector.broadcast %cst : f32 to vector<1x8x8xf32>
    %24 = arith.select %21, %23, %22 : vector<1x8x8xi1>, vector<1x8x8xf32>
    %cst_10 = arith.constant dense<0.000000e+00> : vector<1x8xf32>
    %25 = vector.multi_reduction <add>, %24, %cst_10 [2] : vector<1x8x8xf32> to vector<1x8xf32>
    %26 = vector.shape_cast %25 : vector<1x8xf32> to vector<1x8x1xf32>
    %cst_11 = arith.constant 0.000000e+00 : f32
    %27 = vector.broadcast %cst_11 : f32 to vector<1x8x1xf32>
    %28 = arith.cmpf oeq, %26, %27 : vector<1x8x1xf32>
    %cst_12 = arith.constant 1.000000e+00 : f32
    %29 = vector.broadcast %cst_12 : f32 to vector<1x8x1xf32>
    %30 = arith.divf %29, %26 : vector<1x8x1xf32>
    %cst_13 = arith.constant 0.000000e+00 : f32
    %31 = vector.broadcast %cst_13 : f32 to vector<1x8x1xf32>
    %32 = arith.select %28, %31, %30 : vector<1x8x1xi1>, vector<1x8x1xf32>
    %cst_14 = arith.constant 0.000000e+00 : f32
    %cst_15 = arith.constant 1.000000e+00 : f32
    %33 = vector.broadcast %cst_14 : f32 to vector<1x8x1xf32>
    %34 = vector.broadcast %cst_15 : f32 to vector<1x8x1xf32>
    %35 = arith.select %28, %33, %34 : vector<1x8x1xi1>, vector<1x8x1xf32>
    %c0_16 = arith.constant 0 : index
    %c0_17 = arith.constant 0 : index
    %c0_18 = arith.constant 0 : index
    %36 = vector.load %arg4[%c0_16, %c0_17, %c0_18] : memref<1x4x8xf32, #tpu.memory_space<vmem>>, vector<1x4x8xf32>
    "tpu.trace_start"() <{level = 10 : i32, message = "btl,bdl->btd"}> : () -> ()
    %cst_19 = arith.constant dense<0.000000e+00> : vector<1x8x4xf32>
    %37 = tpu.matmul %24, %36, %cst_19 {dimension_numbers = #tpu.dot_dimension_numbers<[2], [2], [1], [1], [0, 0, 0, 1, 1, 1], [0], [0]>} : vector<1x8x8xf32>, vector<1x4x8xf32>, vector<1x8x4xf32> -> vector<1x8x4xf32>
    "tpu.trace_stop"() : () -> ()
    %38 = vector.broadcast %32 : vector<1x8x1xf32> to vector<1x8x4xf32>
    %39 = arith.mulf %37, %38 : vector<1x8x4xf32>
    %40 = vector.shape_cast %39 : vector<1x8x4xf32> to vector<8x4xf32>
    %41 = vector.shape_cast %35 : vector<1x8x1xf32> to vector<8x1xf32>
    %c0_20 = arith.constant 0 : index
    %c0_21 = arith.constant 0 : index
    %42 = vector.load %arg12[%c0_20, %c0_21] : memref<8x8xf32, #tpu.memory_space<vmem>>, vector<8x8xf32>
    %c0_22 = arith.constant 0 : index
    %c0_23 = arith.constant 0 : index
    %43 = vector.load %arg7[%c0_22, %c0_23] : memref<4x8xf32, #tpu.memory_space<vmem>>, vector<4x8xf32>
    %cst_24 = arith.constant dense<0.000000e+00> : vector<8x8xf32>
    %44 = tpu.matmul %40, %43, %cst_24 {dimension_numbers = #tpu.dot_dimension_numbers<[1], [0], [0], [1], [0, 0, 1, 1], [], []>} : vector<8x4xf32>, vector<4x8xf32>, vector<8x8xf32> -> vector<8x8xf32>
    %c0_25 = arith.constant 0 : index
    %c0_26 = arith.constant 0 : index
    %45 = vector.load %arg8[%c0_25, %c0_26] : memref<1x8xf32, #tpu.memory_space<vmem>>, vector<1x8xf32>
    %46 = vector.broadcast %41 : vector<8x1xf32> to vector<8x8xf32>
    %47 = vector.broadcast %45 : vector<1x8xf32> to vector<8x8xf32>
    %48 = arith.mulf %46, %47 : vector<8x8xf32>
    %49 = arith.addf %44, %48 : vector<8x8xf32>
    %50 = arith.addf %42, %49 : vector<8x8xf32>
    %c0_27 = arith.constant 0 : index
    %c0_28 = arith.constant 0 : index
    %51 = vector.load %arg12[%c0_27, %c0_28] : memref<8x8xf32, #tpu.memory_space<vmem>>, vector<8x8xf32>
    tpu.vector_store %arg12[%c0_27, %c0_28], %50 {strides = array<i32>} : memref<8x8xf32, #tpu.memory_space<vmem>>, vector<8x8xf32>,
    %c0_29 = arith.constant 0 : index
    %c0_30 = arith.constant 0 : index
    %c0_31 = arith.constant 0 : index
    %52 = vector.load %arg5[%c0_29, %c0_30, %c0_31] : memref<1x1x16xf32, #tpu.memory_space<vmem>>, vector<1x1x16xf32>
    %c3 = arith.constant 3 : index
    %53 = memref.load %arg1[%c3] : memref<5xf32, #tpu.memory_space<smem>>
    %c4 = arith.constant 4 : index
    %54 = memref.load %arg1[%c4] : memref<5xf32, #tpu.memory_space<smem>>
    %55 = vector.broadcast %1 : f32 to vector<1x8x1xf32>
    %56 = arith.mulf %55, %0 : vector<1x8x1xf32>
    %57 = vector.broadcast %53 : f32 to vector<1x1x16xf32>
    %58 = arith.mulf %57, %52 : vector<1x1x16xf32>
    %59 = vector.broadcast %56 : vector<1x8x1xf32> to vector<1x8x16xf32>
    %60 = vector.broadcast %58 : vector<1x1x16xf32> to vector<1x8x16xf32>
    %61 = arith.subf %59, %60 : vector<1x8x16xf32>
    %62 = arith.mulf %61, %61 : vector<1x8x16xf32>
    %63 = vector.broadcast %54 : f32 to vector<1x8x16xf32>
    %64 = arith.mulf %62, %63 : vector<1x8x16xf32>
    %65 = vector.broadcast %0 : vector<1x8x1xf32> to vector<1x8x16xf32>
    %66 = vector.broadcast %52 : vector<1x1x16xf32> to vector<1x8x16xf32>
    %67 = arith.cmpf olt, %65, %66 : vector<1x8x16xf32>
    %68 = math.exp %64 : vector<1x8x16xf32>
    %cst_32 = arith.constant 0.000000e+00 : f32
    %69 = vector.broadcast %cst_32 : f32 to vector<1x8x16xf32>
    %70 = arith.select %67, %69, %68 : vector<1x8x16xi1>, vector<1x8x16xf32>
    %cst_33 = arith.constant dense<0.000000e+00> : vector<1x8xf32>
    %71 = vector.multi_reduction <add>, %70, %cst_33 [2] : vector<1x8x16xf32> to vector<1x8xf32>
    %72 = vector.shape_cast %71 : vector<1x8xf32> to vector<1x8x1xf32>
    %cst_34 = arith.constant 0.000000e+00 : f32
    %73 = vector.broadcast %cst_34 : f32 to vector<1x8x1xf32>
    %74 = arith.cmpf oeq, %72, %73 : vector<1x8x1xf32>
    %cst_35 = arith.constant 1.000000e+00 : f32
    %75 = vector.broadcast %cst_35 : f32 to vector<1x8x1xf32>
    %76 = arith.divf %75, %72 : vector<1x8x1xf32>
    %cst_36 = arith.constant 0.000000e+00 : f32
    %77 = vector.broadcast %cst_36 : f32 to vector<1x8x1xf32>
    %78 = arith.select %74, %77, %76 : vector<1x8x1xi1>, vector<1x8x1xf32>
    %cst_37 = arith.constant 0.000000e+00 : f32
    %cst_38 = arith.constant 1.000000e+00 : f32
    %79 = vector.broadcast %cst_37 : f32 to vector<1x8x1xf32>
    %80 = vector.broadcast %cst_38 : f32 to vector<1x8x1xf32>
    %81 = arith.select %74, %79, %80 : vector<1x8x1xi1>, vector<1x8x1xf32>
    %c0_39 = arith.constant 0 : index
    %c0_40 = arith.constant 0 : index
    %c0_41 = arith.constant 0 : index
    %82 = vector.load %arg6[%c0_39, %c0_40, %c0_41] : memref<1x6x16xf32, #tpu.memory_space<vmem>>, vector<1x6x16xf32>
    "tpu.trace_start"() <{level = 10 : i32, message = "btl,bdl->btd"}> : () -> ()
    %cst_42 = arith.constant dense<0.000000e+00> : vector<1x8x6xf32>
    %83 = tpu.matmul %70, %82, %cst_42 {dimension_numbers = #tpu.dot_dimension_numbers<[2], [2], [1], [1], [0, 0, 0, 1, 1, 1], [0], [0]>} : vector<1x8x16xf32>, vector<1x6x16xf32>, vector<1x8x6xf32> -> vector<1x8x6xf32>
    "tpu.trace_stop"() : () -> ()
    %84 = vector.broadcast %78 : vector<1x8x1xf32> to vector<1x8x6xf32>
    %85 = arith.mulf %83, %84 : vector<1x8x6xf32>
    %86 = vector.shape_cast %85 : vector<1x8x6xf32> to vector<8x6xf32>
    %87 = vector.shape_cast %81 : vector<1x8x1xf32> to vector<8x1xf32>
    %c0_43 = arith.constant 0 : index
    %c0_44 = arith.constant 0 : index
    %88 = vector.load %arg12[%c0_43, %c0_44] : memref<8x8xf32, #tpu.memory_space<vmem>>, vector<8x8xf32>
    %c0_45 = arith.constant 0 : index
    %c0_46 = arith.constant 0 : index
    %89 = vector.load %arg9[%c0_45, %c0_46] : memref<6x8xf32, #tpu.memory_space<vmem>>, vector<6x8xf32>
    %cst_47 = arith.constant dense<0.000000e+00> : vector<8x8xf32>
    %90 = tpu.matmul %86, %89, %cst_47 {dimension_numbers = #tpu.dot_dimension_numbers<[1], [0], [0], [1], [0, 0, 1, 1], [], []>} : vector<8x6xf32>, vector<6x8xf32>, vector<8x8xf32> -> vector<8x8xf32>
    %c0_48 = arith.constant 0 : index
    %c0_49 = arith.constant 0 : index
    %91 = vector.load %arg10[%c0_48, %c0_49] : memref<1x8xf32, #tpu.memory_space<vmem>>, vector<1x8xf32>
    %92 = vector.broadcast %87 : vector<8x1xf32> to vector<8x8xf32>
    %93 = vector.broadcast %91 : vector<1x8xf32> to vector<8x8xf32>
    %94 = arith.mulf %92, %93 : vector<8x8xf32>
    %95 = arith.addf %90, %94 : vector<8x8xf32>
    %96 = arith.addf %88, %95 : vector<8x8xf32>
    %c0_50 = arith.constant 0 : index
    %c0_51 = arith.constant 0 : index
    %97 = vector.load %arg12[%c0_50, %c0_51] : memref<8x8xf32, #tpu.memory_space<vmem>>, vector<8x8xf32>
    tpu.vector_store %arg12[%c0_50, %c0_51], %96 {strides = array<i32>} : memref<8x8xf32, #tpu.memory_space<vmem>>, vector<8x8xf32>,
    return
  }
  func.func @transform_0(%arg0: i32) -> i32 {
    %c0_i32 = arith.constant 0 : i32
    %c0_i32_0 = arith.constant 0 : i32
    return %c0_i32 : i32
  }
  func.func @transform_1(%arg0: i32) -> (i32, i32, i32) {
    %c0_i32 = arith.constant 0 : i32
    %c0_i32_0 = arith.constant 0 : i32
    %c0_i32_1 = arith.constant 0 : i32
    return %arg0, %c0_i32, %c0_i32_0 : i32, i32, i32
  }
  func.func @transform_2(%arg0: i32) -> (i32, i32, i32) {
    %c0_i32 = arith.constant 0 : i32
    %c0_i32_0 = arith.constant 0 : i32
    %c0_i32_1 = arith.constant 0 : i32
    return %arg0, %c0_i32, %c0_i32_0 : i32, i32, i32
  }
  func.func @transform_3(%arg0: i32) -> (i32, i32, i32) {
    %c0_i32 = arith.constant 0 : i32
    %c0_i32_0 = arith.constant 0 : i32
    %c0_i32_1 = arith.constant 0 : i32
    return %arg0, %c0_i32, %c0_i32_0 : i32, i32, i32
  }
  func.func @transform_4(%arg0: i32) -> (i32, i32, i32) {
    %c0_i32 = arith.constant 0 : i32
    %c0_i32_0 = arith.constant 0 : i32
    %c0_i32_1 = arith.constant 0 : i32
    return %arg0, %c0_i32, %c0_i32_0 : i32, i32, i32
  }
  func.func @transform_5(%arg0: i32) -> (i32, i32, i32) {
    %c0_i32 = arith.constant 0 : i32
    %c0_i32_0 = arith.constant 0 : i32
    %c0_i32_1 = arith.constant 0 : i32
    return %arg0, %c0_i32, %c0_i32_0 : i32, i32, i32
  }
  func.func @transform_6(%arg0: i32) -> (i32, i32) {
    %c0_i32 = arith.constant 0 : i32
    %c0_i32_0 = arith.constant 0 : i32
    %c0_i32_1 = arith.constant 0 : i32
    return %c0_i32, %c0_i32_0 : i32, i32
  }
  func.func @transform_7(%arg0: i32) -> (i32, i32) {
    %c0_i32 = arith.constant 0 : i32
    %c0_i32_0 = arith.constant 0 : i32
    %c0_i32_1 = arith.constant 0 : i32
    return %c0_i32, %c0_i32_0 : i32, i32
  }
  func.func @transform_8(%arg0: i32) -> (i32, i32) {
    %c0_i32 = arith.constant 0 : i32
    %c0_i32_0 = arith.constant 0 : i32
    %c0_i32_1 = arith.constant 0 : i32
    return %c0_i32, %c0_i32_0 : i32, i32
  }
  func.func @transform_9(%arg0: i32) -> (i32, i32) {
    %c0_i32 = arith.constant 0 : i32
    %c0_i32_0 = arith.constant 0 : i32
    %c0_i32_1 = arith.constant 0 : i32
    return %c0_i32, %c0_i32_0 : i32, i32
  }
  func.func @transform_10(%arg0: i32) -> (i32, i32) {
    %c0_i32 = arith.constant 0 : i32
    %c0_i32_0 = arith.constant 0 : i32
    %c0_i32_1 = arith.constant 0 : i32
    return %c0_i32, %c0_i32_0 : i32, i32
  }
  func.func @transform_11(%arg0: i32) -> (i32, i32) {
    %c0_i32 = arith.constant 0 : i32
    %c0_i32_0 = arith.constant 0 : i32
    return %arg0, %c0_i32 : i32, i32
  }
}

</mosaic_0001>

<bundles_post_ra>
// kernel: tpu_custom_call.1
= control target key start
LH: loop header
LB: loop body
LE: loop exit
PB: predicated region body
PF: predicated region fallthrough
CT: control target
= control target key end

     0   :  { %16 = vsyncpa [#allocation3], 0  ;;  %s1171_s17 = smov 0   ;;  %s1264_s0 = inlined_call_operand.vmem [shape: f32[5], index: 0, kind: input, shape index: {}]   ;;  %s1265_s1 = inlined_call_operand.vmem [shape: f32[2,8,1], index: 1, kind: input, shape index: {}]   ;;  %s1266_s2 = inlined_call_operand.vmem [shape: f32[2,1,8], index: 2, kind: input, shape index: {}]   ;;  %s1267_s3 = inlined_call_operand.vmem [shape: f32[2,4,8], index: 3, kind: input, shape index: {}]   ;;  %s1268_s4 = inlined_call_operand.vmem [shape: f32[2,1,16], index: 4, kind: input, shape index: {}]   ;;  %s1269_s5 = inlined_call_operand.vmem [shape: f32[2,6,16], index: 5, kind: input, shape index: {}]   ;;  %s1270_s6 = inlined_call_operand.vmem [shape: f32[4,8], index: 6, kind: input, shape index: {}]   ;;  %s1271_s7 = inlined_call_operand.vmem [shape: f32[1,8], index: 7, kind: input, shape index: {}]   ;;  %s1272_s8 = inlined_call_operand.vmem [shape: f32[6,8], index: 8, kind: input, shape index: {}]   ;;  %s1273_s9 = inlined_call_operand.vmem [shape: f32[1,8], index: 9, kind: input, shape index: {}]   ;;  %s1274_s10 = inlined_call_operand.vmem [shape: f32[1,8], index: 10, kind: input, shape index: {}]   ;;  %s1275_s11 = inlined_call_operand.vmem [shape: f32[16,8], index: 11, kind: output, shape index: {}]  }
   0x1 LB: > { %s991_s18 = sadd.s32 4294967295, %s1104_s17   ;;  %p993_p0 = scmp.ge.s32.totalorder %s1104_s17, 1  ;;  %s1104_s17 = sphi %s1171_s17, %s22_s17  }
   0x2   : > { %p309_p1 = scmp.lt.s32.totalorder %s1104_s17, 3  ;;  %s322_s21 = sshll.u32 %s1264_s0, 4  ;;  %s323_s21 = int_to_ptr.vmem [resolvable:$true] %s322_s21 }
   0x3   : > { %p1055_p3 = scmp.eq.s32.totalorder %s991_s18, 0  ;;  %s1079_s23 = scalar_lea.vmem %s323_s21, 16 }
   0x4   : > { %p1182_p2 = pnand %p993_p0, %p309_p1  ;;  %p1080_p6 = scmp.ne.s32.totalorder %s323_s21, %s1079_s23 }
   0x5   : > { %p1087_p10 = scmp.lt.s32.totalorder %s323_s21, %s323_s21  ;;  %p1088_p11 = scmp.lt.s32.totalorder %s1079_s23, %s1079_s23 }
   0x6   : > { %p1051_p4 = pneg %p1182_p2 }
   0x7   : > { %p1089_p12 = por %p1088_p11, %p1087_p10 }
   0x8   : > { %p1052_p5 = pnand %p1055_p3, %p1051_p4 }
   0xa   : > { %p1081_p7 = pneg %p1052_p5 }
   0xc   : > { %p1082_p8 = pnand %p1081_p7, %p1080_p6 }
   0xe   : > { %p1083_p9 = pneg %p1082_p8 }
  0x10   : > { %p1090_p13 = pnand %p1089_p12, %p1083_p9 }
  0x12   : > { %1093 = shalt.err (!%p1090_p13)
}
  0x13   : > { %s1106_s24 = smov [#allocation2]   ;;  %383 = sbr.rel (%p1182_p2) target bundleno = 835 (0x343), region = 64 }
  0x14   : > { %1054 = dma.vmem_to_smem (!%p1052_p5), %s323_s21, 16, %s1106_s24, [#allocation3]  }
  0x1a   : > { %1099 = dma.done.wait (%p1055_p3), [#allocation3], 16  }
  0x1b   : > { %1101 = vsyncadd (%p1055_p3), [#allocation3], 4294967280 }
  0x1c   : > { %389 = sfence }
  0x1d   : > { %p436_p0 = scmp.lt.s32.totalorder %s991_s18, 1  ;;  %s459_s25 = sld [smem:[#allocation2]]  ;;  %v1107_v0 = vmov 0   ;;  %v1108_v4 = vmov 0.0   ;;  %vm467_vm0 = vcmask 64512   ;;  %vm1109_vm1 = vmmov 0  }
  0x1e   : > { %1070 = vset.pattern.permute.xlu0 %v1107_v0  ;;  %1027 = vmatprep.subr.mxu0 %v1108_v4  ;;  %s1003_s15 = sld [smem:[#allocation2 + $0x1]]  ;;  %s1010_s16 = sld [smem:[#allocation2 + $0x3]]  ;;  %v482_v6 = vlaneseq  ;;  %vm707_vm4 = vcmask 130048   ;;  %v593_v37 = vld [vmem:[%s1270_s6] sm:$0xf]  ;;  %vm606_vm5 = vcmask 1043456  }
  0x1f   : > { %s1278_s18 = smov (!%p436_p0, %s991_s18), 1  ;;  %1032 = vmatprep.subr.mxu1 %v1108_v4  ;;  %1029 = vmatprep.mubr.msk.f32.mxu0 %vm1109_vm1, %v1108_v4  ;;  %s1011_s27 = sld [smem:[#allocation2 + $0x4]]  ;;  %v1002_v38 = vld [vmem:[%s1274_s10] ss:$0 sm:$0xff]  ;;  %v1110_v41 = vmov 1.0   ;;  %vm602_vm8 = vcmask 31744  }
  0x20   : > { %s1193_s26 = sshll.u32 %s1278_s18, 3  ;;  %s999_s30 = sshll.u32 %s1278_s18, 2  ;;  %1034 = vmatprep.mubr.msk.f32.mxu1 %vm1109_vm1, %v1108_v4  ;;  %v483_v7 = vshrl.u32 %v482_v6, 7  ;;  %1033 = vmatpush3.msk.msra.mxu1 %vm606_vm5, %v593_v37  ;;  %v795_v49 = vld [vmem:[%s1272_s8] sm:$0x3f]  ;;  %vm808_vm9 = vcmask 1045504  }
  0x21   : > { %s439_s29 = scalar_lea.vmem %s1265_s1, %s1193_s26  ;;  %s446_s14 = scalar_lea.vmem %s1267_s3, %s999_s30  ;;  %1037 = vmatprep.subr.mxu1 %v1108_v4  ;;  %v1007_v51 = vld [vmem:[%s1271_s7] ss:$0 sm:$0xff]  ;;  %vm804_vm10 = vcmask 48128  }
  0x22   : > { %v458_v1 = vld [vmem:[%s439_s29] sm:$0xff]  ;;  %s442_s21 = scalar_lea.vmem %s1266_s2, %s1278_s18  ;;  %s449_s24 = scalar_lea.vmem %s1268_s4, %s1278_s18  ;;  %v484_v13 = vsub.s32 0, %v483_v7 }
  0x23   : > { %v472_v2 = vstv %s459_s25  ;;  %v514_v5 = vld [vmem:[%s446_s14] sm:$0xf]  ;;  %s1004_s25 = sld [smem:[#allocation2 + $0x2]]  ;;  %s1229_s12 = scalar_lea.vmem %s1275_s11, %s1193_s26 }
  0x24   : > { %v473_v3 = vmul.f32 %v472_v2, %v458_v1  ;;  %1028 = vmatpush3.xpose.msk.msra.mxu0 %vm467_vm0, %v514_v5  ;;  %v469_v8 = vld [vmem:[%s442_s21] sm:$0x1]  ;;  %v474_v9 = vstv %s1003_s15  ;;  %v685_v11 = vstv %s1010_s16  ;;  %468 = vst.msk [vmem:[%s1229_s12] sm:$0xff] %vm467_vm0, %v1002_v38  ;;  %s453_s19 = scalar_lea.vmem %s1269_s5, %s1193_s26 }
  0x25   : > { %1042 = vmatprep.subr.mxu0 %v1108_v4  ;;  %v682_v10 = vld [vmem:[%s449_s24] sm:$0x1]  ;;  %v475_v12 = vmul.f32 %v474_v9, %v469_v8  ;;  %v695_v21 = vstv %s1011_s27  ;;  %v500_v28 = vrot.slane %v469_v8, %v484_v13 }
  0x26   : > { %478 = vperm.xlu0 %1070, %v473_v3   ;;  %v686_v14 = vmul.f32 %v685_v11, %v682_v10  ;;  %v701_v30 = vrot.slane %v682_v10, %v484_v13  ;;  %v716_v48 = vld [vmem:[%s453_s19] sm:$0x3f] }
  0x27   : > { %v485_v15 = vrot.slane %v475_v12, %v484_v13  ;;  %v1014_v63 = vld [vmem:[%s1273_s9] ss:$0 sm:$0xff] }
  0x28   : > { %v691_v16 = vrot.slane %v686_v14, %v484_v13 }
  0x29   : > { %v489_v20 = vstv %s1004_s25 }
  0x2a   : > { %493 = vperm.xlu0 %1070, %v458_v1  }
  0x2b   : > { %v592_v53 = vld [vmem:[%s1229_s12] sm:$0xff] }
  0xa5   : > { %v479_v17 = vpop.permute.xlu0 %478 }
  0xa6   : > { %v487_v18 = vsub.f32 %v479_v17, %v485_v15  ;;  %v693_v19 = vsub.f32 %v479_v17, %v691_v16 }
  0xa8   : > { %v488_v22 = vmul.f32 %v487_v18, %v487_v18  ;;  %v694_v23 = vmul.f32 %v693_v19, %v693_v19 }
  0xa9   : > { %v494_v29 = vpop.permute.xlu0 %493 }
  0xaa   : > { %v490_v24 = vmul.f32 %v489_v20, %v488_v22  ;;  %v696_v25 = vmul.f32 %v695_v21, %v694_v23  ;;  %vm502_vm2 = vcmp.lt.f32.partialorder %v494_v29, %v500_v28  ;;  %vm703_vm3 = vcmp.lt.f32.partialorder %v494_v29, %v701_v30 }
  0xac   : > { %v503_v26 = vmul.f32 1.442695, %v490_v24  ;;  %v704_v27 = vmul.f32 1.442695, %v696_v25 }
  0xae   : > { %1071 = vpow2.f32 %v503_v26 }
  0xaf   : > { %1073 = vpow2.f32 %v704_v27 }
  0xb8   : > { %v1072_v31 = vpop.eup %1071 }
  0xb9   : > { %v1074_v32 = vpop.eup %1073  ;;  %v505_v33 = vsel %vm502_vm2, 0.0, %v1072_v31 }
  0xba   : > { %1030 = vmatmul.mubr.msk.f32.vlgmr.msra.gmra.mrb[0].mxu0 %vm467_vm0, %v505_v33  ;;  %v506_v34 = vsel %vm467_vm0, %v505_v33, 0.0  ;;  %v706_v35 = vsel %vm703_vm3, 0.0, %v1074_v32 }
  0xbb   : > { %507 = vadd.xlane.f32.xlu1 %v506_v34  ;;  %1044 = vmatprep.mubr.msk.f32.mxu0 %vm1109_vm1, %v1108_v4  ;;  %v708_v36 = vsel %vm707_vm4, %v706_v35, 0.0 }
  0xbc   : > { %1043 = vmatpush3.msk.msra.mxu0 %vm808_vm9, %v795_v49 }
  0xbf   : > { %709 = vadd.xlane.f32.xlu1 %v708_v36 }
 0x148   : > { %v508_v39 = vpop.xlane.xlu1 %507 }
 0x149   : > { %1075 = vrcp.f32 %v508_v39  ;;  %vm509_vm7 = vcmp.eq.f32.partialorder %v508_v39, 0.0 }
 0x14a   : > { %v513_v50 = vsel %vm509_vm7, 0.0, %v1110_v41 }
 0x14b   : > { %v601_v52 = vmul.f32 %v1007_v51, %v513_v50 }
 0x14c   : > { %v710_v40 = vpop.xlane.xlu1 %709 }
 0x14d   : > { %vm711_vm6 = vcmp.eq.f32.partialorder %v710_v40, 0.0  ;;  %1077 = vrcp.f32 %v710_v40 }
 0x14e   : > { %v715_v42 = vsel %vm711_vm6, 0.0, %v1110_v41 }
 0x14f   : > { %v803_v0 = vmul.f32 %v1014_v63, %v715_v42 }
 0x153   : > { %v1076_v43 = vpop.eup %1075 }
 0x154   : > { %v512_v44 = vsel %vm509_vm7, 0.0, %v1076_v43 }
 0x157   : > { %v1078_v55 = vpop.eup %1077 }
 0x158   : > { %v714_v59 = vsel %vm711_vm6, 0.0, %v1078_v55 }
 0x18d   : > { %v587_v45 = vpop.f32.mrb[0].mxu0 }
 0x18e   : > { %v591_v46 = vmul.f32 %v587_v45, %v512_v44  ;;  %v1031_v47 = vpop.f32.mrb[1].mxu0 }
 0x190   : > { %1035 = vmatmul.mubr.msk.f32.vlgmr.msra.gmra.mrb[0].mxu1 %vm602_vm8, %v591_v46 }
 0x191   : > { %1038 = vmatpush3.xpose.msk.msra.mxu1 %vm707_vm4, %v716_v48  ;;  %1039 = vmatprep.mubr.msk.f32.mxu1 %vm1109_vm1, %v1108_v4 }
 0x194   : > { %1040 = vmatmul.mubr.msk.f32.vlgmr.msra.gmra.mrb[2].mxu1 %vm707_vm4, %v706_v35 }
 0x263   : > { %v676_v54 = vpop.f32.mrb[0].mxu1 }
 0x264   : > { %v677_v56 = vadd.f32 %v676_v54, %v601_v52  ;;  %v1036_v57 = vpop.f32.mrb[1].mxu1 }
 0x266   : > { %v680_v58 = vadd.f32 %v677_v56, %v592_v53 }
 0x267   : > { %v789_v60 = vpop.f32.mrb[2].mxu1 }
 0x268   : > { %681 = vst.msk [vmem:[%s1229_s12] sm:$0xff] %vm467_vm0, %v680_v58  ;;  %v793_v61 = vmul.f32 %v789_v60, %v714_v59  ;;  %v1041_v62 = vpop.f32.mrb[3].mxu1 }
 0x26a   : > { %1045 = vmatmul.mubr.msk.f32.vlgmr.msra.gmra.mrb[2].mxu0 %vm804_vm10, %v793_v61 }
 0x26f   : > { %v794_v4 = vld [vmem:[%s1229_s12] sm:$0xff] }
 0x33d   : > { %v878_v1 = vpop.f32.mrb[2].mxu0 }
 0x33e   : > { %v879_v2 = vadd.f32 %v878_v1, %v803_v0  ;;  %v1046_v3 = vpop.f32.mrb[3].mxu0 }
 0x340   : > { %v882_v5 = vadd.f32 %v879_v2, %v794_v4 }
 0x342   : > { %883 = vst.msk [vmem:[%s1229_s12] sm:$0xff] %vm467_vm0, %v882_v5 }
 0x343 PF: > { %s22_s17 = sadd.s32 1, %s1104_s17  }
 0x344   : > { %p19_p1 = scmp.ge.s32.totalorder %s22_s17, 4  }
 0x346   :  { %21 = sbr.rel (!%p19_p1) target bundleno = 1 (0x1), region = 111 }
 0x34d   :  { %903 = vsyncpa [#allocation3], 1 }
 0x34e   :  { %905 = vsyncpa [#allocation3 + $0x1], 1 }

</bundles_post_ra>
